<compile_context>
chip_gen: v6e
topology: v6e:2x2x1
jax: 0.10.0
libtpu: 0.0.40
codegen_flags: <defaults>
</compile_context>

<pallas_src>
import functools

import jax
import jax.numpy as jnp
from jax.experimental import pallas as pl
from jax.experimental.pallas import tpu as pltpu

NEG_SLOPE = 0.01   # torch.nn.LeakyReLU default
TILE_B = 128       # batch tile (matches v5e MXU M; fine on v6e/v7x)
LANE = 128         # TPU lane width


def _leaky_relu(x):
    # For 0 < slope < 1, LeakyReLU(x) == max(x, slope * x): one vmul + one vmax.
    return jnp.maximum(x, NEG_SLOPE * x)


def _round_up(n, m):
    return ((n + m - 1) // m) * m


def _decoder_kernel(zp_ref, w1_ref, b1_ref, w2_ref, b2_ref, w3_ref, b3_ref,
                    out_ref):
    """Fused supervised-WAE decoder MLP over one batch tile.

    h1  = LeakyReLU(concat([z, pars]) @ W1 + b1)
    h2  = LeakyReLU(h1 @ W2 + b2)
    out = h2 @ W3 + b3

    Activations/weights arrive lane-dense (padded to 128) in bf16; all matmuls
    accumulate in f32 on the MXU; biases are added in f32.
    """
    zp = zp_ref[...]

    h1 = jnp.dot(zp, w1_ref[...], preferred_element_type=jnp.float32) + b1_ref[...]
    h1 = _leaky_relu(h1).astype(w2_ref.dtype)

    h2 = jnp.dot(h1, w2_ref[...], preferred_element_type=jnp.float32) + b2_ref[...]
    h2 = _leaky_relu(h2).astype(w3_ref.dtype)

    out = jnp.dot(h2, w3_ref[...], preferred_element_type=jnp.float32) + b3_ref[...]
    out_ref[...] = out.astype(out_ref.dtype)


def _prepare_operands(params, compute_dtype):
    """Host-side, once: fold W1 = [W1z; W1p], zero-pad hidden/out lanes to 128."""
    w1 = jnp.concatenate([params["w1z"], params["w1p"]], axis=0)
    w2, w3 = params["w2"], params["w3"]
    b1, b2, b3 = params["b1"], params["b2"], params["b3"]

    hidden = w1.shape[1]
    out_dim = w3.shape[1]
    h_pad = _round_up(hidden, LANE)
    d_pad = _round_up(out_dim, LANE)
    dh, dd = h_pad - hidden, d_pad - out_dim

    # Zero padding keeps the math exact: padded h1/h2 lanes stay 0 and padded
    # weight rows/cols contribute nothing.
    w1 = jnp.pad(w1, ((0, 0), (0, dh))).astype(compute_dtype)
    b1 = jnp.pad(b1, ((0, 0), (0, dh))).astype(jnp.float32)
    w2 = jnp.pad(w2, ((0, dh), (0, dh))).astype(compute_dtype)
    b2 = jnp.pad(b2, ((0, 0), (0, dh))).astype(jnp.float32)
    w3 = jnp.pad(w3, ((0, dh), (0, dd))).astype(compute_dtype)
    b3 = jnp.pad(b3, ((0, 0), (0, dd))).astype(jnp.float32)

    return (w1, b1, w2, b2, w3, b3), out_dim, d_pad


@functools.partial(jax.jit, static_argnames=("tile_b", "compute_dtype"))
def supervised_wae_forward(z, pars, params, *, tile_b=TILE_B,
                           compute_dtype=jnp.bfloat16):
    """forward(z, pars) == decoder(z, pars), as a single batch-tiled Pallas call."""
    B = z.shape[0]
    (w1, b1, w2, b2, w3, b3), out_dim, d_pad = _prepare_operands(
        params, compute_dtype)
    in_dim = w1.shape[0]

    # Single fused input: concat([z, pars]); pad batch rows to a tile multiple.
    zp = jnp.concatenate([z, pars], axis=-1).astype(compute_dtype)
    b_pad = _round_up(max(B, 1), tile_b)
    zp = jnp.pad(zp, ((0, b_pad - B), (0, 0)))

    def resident(shape):
        # Weights/biases: one block, same index every grid step -> VMEM-resident.
        return pl.BlockSpec(shape, lambda i: (0, 0))

    out_padded = pl.pallas_call(
        _decoder_kernel,
        out_shape=jax.ShapeDtypeStruct((b_pad, d_pad), jnp.float32),
        grid=(b_pad // tile_b,),
        in_specs=[
            pl.BlockSpec((tile_b, in_dim), lambda i: (i, 0)),   # zp: batch-tiled
            resident(w1.shape), resident(b1.shape),
            resident(w2.shape), resident(b2.shape),
            resident(w3.shape), resident(b3.shape),
        ],
        out_specs=pl.BlockSpec((tile_b, d_pad), lambda i: (i, 0)),
        compiler_params=pltpu.CompilerParams(
            dimension_semantics=("parallel",)),
    )(zp, w1, b1, w2, b2, w3, b3)

    return out_padded[:B, :out_dim]


def init_params(key, latent_dim, pars_dim, hidden_dim, out_dim):
    """Deterministic synthetic weights (same shapes nn.Linear would create)."""
    ks = jax.random.split(key, 4)
    scale = 0.1
    return {
        # first layer acts on concat([z, pars]); stored split, folded in wrapper
        "w1z": scale * jax.random.normal(ks[0], (latent_dim, hidden_dim), jnp.float32),
        "w1p": scale * jax.random.normal(ks[1], (pars_dim, hidden_dim), jnp.float32),
        "b1": jnp.zeros((1, hidden_dim), jnp.float32),
        "w2": scale * jax.random.normal(ks[2], (hidden_dim, hidden_dim), jnp.float32),
        "b2": jnp.zeros((1, hidden_dim), jnp.float32),
        "w3": scale * jax.random.normal(ks[3], (hidden_dim, out_dim), jnp.float32),
        "b3": jnp.zeros((1, out_dim), jnp.float32),
    }


def _reference_forward(z, pars, p):
    """Pure-JAX f32 reference of the same decoder MLP."""
    def lrelu(x):
        return jnp.where(x > 0, x, NEG_SLOPE * x)
    w1 = jnp.concatenate([p["w1z"], p["w1p"]], axis=0)
    h1 = lrelu(jnp.concatenate([z, pars], axis=-1) @ w1 + p["b1"])
    h2 = lrelu(h1 @ p["w2"] + p["b2"])
    return h2 @ p["w3"] + p["b3"]


if __name__ == "__main__":
    # Small shapes consistent with the module's forward(z, pars)
    B, LATENT, PARS, HIDDEN, OUT = 2, 8, 4, 32, 16

    key = jax.random.PRNGKey(0)
    kz, kp, kw = jax.random.split(key, 3)

    z = jax.random.normal(kz, (B, LATENT), jnp.float32)
    pars = jax.random.normal(kp, (B, PARS), jnp.float32)
    params = init_params(kw, LATENT, PARS, HIDDEN, OUT)

    out = supervised_wae_forward(z, pars, params)
    out = jax.block_until_ready(out)

    ref = _reference_forward(z, pars, params)
    assert out.shape == (B, OUT), f"bad output shape {out.shape}"
    # bf16 operands with f32 accumulation: allow small quantization error.
    assert jnp.allclose(out, ref, atol=2e-2, rtol=2e-2), "mismatch vs JAX reference"

    print("KERNEL_OK")
</pallas_src>

<mosaic_0001>
module attributes {stable_mosaic.version = 11 : i64} {
  func.func @_decoder_kernel(%arg0: i32, %arg1: memref<128x12xbf16, #tpu.memory_space<vmem>>, %arg2: memref<12x128xbf16, #tpu.memory_space<vmem>>, %arg3: memref<1x128xf32, #tpu.memory_space<vmem>>, %arg4: memref<128x128xbf16, #tpu.memory_space<vmem>>, %arg5: memref<1x128xf32, #tpu.memory_space<vmem>>, %arg6: memref<128x128xbf16, #tpu.memory_space<vmem>>, %arg7: memref<1x128xf32, #tpu.memory_space<vmem>>, %arg8: memref<128x128xf32, #tpu.memory_space<vmem>>) attributes {dimension_semantics = [#tpu.dimension_semantics<parallel>], iteration_bounds = array<i64: 1>, scalar_prefetch = 0 : i64, scratch_operands = 0 : i64, tpu.core_type = #tpu.core_type<tc>, window_params = [{transform_indices = @transform_0, window_bounds = array<i64: 128, 12>}, {pipeline_mode = #tpu.pipeline_mode<synchronous>, transform_indices = @transform_1, window_bounds = array<i64: 12, 128>}, {pipeline_mode = #tpu.pipeline_mode<synchronous>, transform_indices = @transform_2, window_bounds = array<i64: 1, 128>}, {pipeline_mode = #tpu.pipeline_mode<synchronous>, transform_indices = @transform_3, window_bounds = array<i64: 128, 128>}, {pipeline_mode = #tpu.pipeline_mode<synchronous>, transform_indices = @transform_4, window_bounds = array<i64: 1, 128>}, {pipeline_mode = #tpu.pipeline_mode<synchronous>, transform_indices = @transform_5, window_bounds = array<i64: 128, 128>}, {pipeline_mode = #tpu.pipeline_mode<synchronous>, transform_indices = @transform_6, window_bounds = array<i64: 1, 128>}, {transform_indices = @transform_7, window_bounds = array<i64: 128, 128>}]} {
    %c0 = arith.constant 0 : index
    %c0_0 = arith.constant 0 : index
    %0 = vector.load %arg1[%c0, %c0_0] : memref<128x12xbf16, #tpu.memory_space<vmem>>, vector<128x12xbf16>
    %c0_1 = arith.constant 0 : index
    %c0_2 = arith.constant 0 : index
    %1 = vector.load %arg2[%c0_1, %c0_2] : memref<12x128xbf16, #tpu.memory_space<vmem>>, vector<12x128xbf16>
    %cst = arith.constant dense<0.000000e+00> : vector<128x128xf32>
    %2 = tpu.matmul %0, %1, %cst {dimension_numbers = #tpu.dot_dimension_numbers<[1], [0], [0], [1], [0, 0, 1, 1], [], []>} : vector<128x12xbf16>, vector<12x128xbf16>, vector<128x128xf32> -> vector<128x128xf32>
    %c0_3 = arith.constant 0 : index
    %c0_4 = arith.constant 0 : index
    %3 = vector.load %arg3[%c0_3, %c0_4] : memref<1x128xf32, #tpu.memory_space<vmem>>, vector<1x128xf32>
    %4 = vector.broadcast %3 : vector<1x128xf32> to vector<128x128xf32>
    %5 = arith.addf %2, %4 : vector<128x128xf32>
    %cst_5 = arith.constant 0.00999999977 : f32
    %6 = vector.broadcast %cst_5 : f32 to vector<128x128xf32>
    %7 = arith.mulf %6, %5 : vector<128x128xf32>
    %8 = arith.maximumf %5, %7 : vector<128x128xf32>
    %9 = arith.truncf %8 : vector<128x128xf32> to vector<128x128xbf16>
    %c0_6 = arith.constant 0 : index
    %c0_7 = arith.constant 0 : index
    %10 = vector.load %arg4[%c0_6, %c0_7] : memref<128x128xbf16, #tpu.memory_space<vmem>>, vector<128x128xbf16>
    %cst_8 = arith.constant dense<0.000000e+00> : vector<128x128xf32>
    %11 = tpu.matmul %9, %10, %cst_8 {dimension_numbers = #tpu.dot_dimension_numbers<[1], [0], [0], [1], [0, 0, 1, 1], [], []>} : vector<128x128xbf16>, vector<128x128xbf16>, vector<128x128xf32> -> vector<128x128xf32>
    %c0_9 = arith.constant 0 : index
    %c0_10 = arith.constant 0 : index
    %12 = vector.load %arg5[%c0_9, %c0_10] : memref<1x128xf32, #tpu.memory_space<vmem>>, vector<1x128xf32>
    %13 = vector.broadcast %12 : vector<1x128xf32> to vector<128x128xf32>
    %14 = arith.addf %11, %13 : vector<128x128xf32>
    %cst_11 = arith.constant 0.00999999977 : f32
    %15 = vector.broadcast %cst_11 : f32 to vector<128x128xf32>
    %16 = arith.mulf %15, %14 : vector<128x128xf32>
    %17 = arith.maximumf %14, %16 : vector<128x128xf32>
    %18 = arith.truncf %17 : vector<128x128xf32> to vector<128x128xbf16>
    %c0_12 = arith.constant 0 : index
    %c0_13 = arith.constant 0 : index
    %19 = vector.load %arg6[%c0_12, %c0_13] : memref<128x128xbf16, #tpu.memory_space<vmem>>, vector<128x128xbf16>
    %cst_14 = arith.constant dense<0.000000e+00> : vector<128x128xf32>
    %20 = tpu.matmul %18, %19, %cst_14 {dimension_numbers = #tpu.dot_dimension_numbers<[1], [0], [0], [1], [0, 0, 1, 1], [], []>} : vector<128x128xbf16>, vector<128x128xbf16>, vector<128x128xf32> -> vector<128x128xf32>
    %c0_15 = arith.constant 0 : index
    %c0_16 = arith.constant 0 : index
    %21 = vector.load %arg7[%c0_15, %c0_16] : memref<1x128xf32, #tpu.memory_space<vmem>>, vector<1x128xf32>
    %22 = vector.broadcast %21 : vector<1x128xf32> to vector<128x128xf32>
    %23 = arith.addf %20, %22 : vector<128x128xf32>
    %c0_17 = arith.constant 0 : index
    %c0_18 = arith.constant 0 : index
    %24 = vector.load %arg8[%c0_17, %c0_18] : memref<128x128xf32, #tpu.memory_space<vmem>>, vector<128x128xf32>
    tpu.vector_store %arg8[%c0_17, %c0_18], %23 {strides = array<i32>} : memref<128x128xf32, #tpu.memory_space<vmem>>, vector<128x128xf32>,
    return
  }
  func.func @transform_0(%arg0: i32) -> (i32, i32) {
    %c0_i32 = arith.constant 0 : i32
    %c0_i32_0 = arith.constant 0 : i32
    return %arg0, %c0_i32 : i32, i32
  }
  func.func @transform_1(%arg0: i32) -> (i32, i32) {
    %c0_i32 = arith.constant 0 : i32
    %c0_i32_0 = arith.constant 0 : i32
    %c0_i32_1 = arith.constant 0 : i32
    return %c0_i32, %c0_i32_0 : i32, i32
  }
  func.func @transform_2(%arg0: i32) -> (i32, i32) {
    %c0_i32 = arith.constant 0 : i32
    %c0_i32_0 = arith.constant 0 : i32
    %c0_i32_1 = arith.constant 0 : i32
    return %c0_i32, %c0_i32_0 : i32, i32
  }
  func.func @transform_3(%arg0: i32) -> (i32, i32) {
    %c0_i32 = arith.constant 0 : i32
    %c0_i32_0 = arith.constant 0 : i32
    %c0_i32_1 = arith.constant 0 : i32
    return %c0_i32, %c0_i32_0 : i32, i32
  }
  func.func @transform_4(%arg0: i32) -> (i32, i32) {
    %c0_i32 = arith.constant 0 : i32
    %c0_i32_0 = arith.constant 0 : i32
    %c0_i32_1 = arith.constant 0 : i32
    return %c0_i32, %c0_i32_0 : i32, i32
  }
  func.func @transform_5(%arg0: i32) -> (i32, i32) {
    %c0_i32 = arith.constant 0 : i32
    %c0_i32_0 = arith.constant 0 : i32
    %c0_i32_1 = arith.constant 0 : i32
    return %c0_i32, %c0_i32_0 : i32, i32
  }
  func.func @transform_6(%arg0: i32) -> (i32, i32) {
    %c0_i32 = arith.constant 0 : i32
    %c0_i32_0 = arith.constant 0 : i32
    %c0_i32_1 = arith.constant 0 : i32
    return %c0_i32, %c0_i32_0 : i32, i32
  }
  func.func @transform_7(%arg0: i32) -> (i32, i32) {
    %c0_i32 = arith.constant 0 : i32
    %c0_i32_0 = arith.constant 0 : i32
    return %arg0, %c0_i32 : i32, i32
  }
}

</mosaic_0001>

<bundles_post_ra>
// kernel: supervised_wae_forward.1
= control target key start
LH: loop header
LB: loop body
LE: loop exit
PB: predicated region body
PF: predicated region fallthrough
CT: control target
= control target key end

     0   :  { %vm122_vm0 = vcmask 1045504   ;;  %vm97_vm1 = vcmask 97280   ;;  %s1060_s1 = inlined_call_operand.vmem [shape: bf16[12,128], index: 1, kind: input, shape index: {}]   ;;  %s1061_s0 = inlined_call_operand.vmem [shape: bf16[128,12], index: 0, kind: input, shape index: {}]   ;;  %s1062_s3 = inlined_call_operand.vmem [shape: bf16[128,128], index: 3, kind: input, shape index: {}]   ;;  %s1063_s5 = inlined_call_operand.vmem [shape: bf16[128,128], index: 5, kind: input, shape index: {}]   ;;  %s1064_s2 = inlined_call_operand.vmem [shape: f32[1,128], index: 2, kind: input, shape index: {}]   ;;  %s1065_s4 = inlined_call_operand.vmem [shape: f32[1,128], index: 4, kind: input, shape index: {}]   ;;  %s1066_s6 = inlined_call_operand.vmem [shape: f32[1,128], index: 6, kind: input, shape index: {}]   ;;  %s1067_s7 = inlined_call_operand.vmem [shape: f32[128,128], index: 7, kind: output, shape index: {}]  }
   0x1   :  { %v819_v0 = vld [vmem:[%s1060_s1] sm:$0x3f]   ;;  %v821_v3 = vld [vmem:[%s1061_s0 + $0x8] sm:$0xff]   ;;  %v822_v4 = vld [vmem:[%s1061_s0 + $0x10] sm:$0xff]  }
   0x2   :  { %v820_v1 = vld [vmem:[%s1061_s0] sm:$0xff]   ;;  %818 = vmatprep.subr.msk.bf16.mxu0 %vm122_vm0, %v819_v0  ;;  %v124_v2 = vsel %vm122_vm0, %v819_v0, 0  ;;  %v823_v5 = vld [vmem:[%s1061_s0 + $0x18] sm:$0xff]   ;;  %v829_v7 = vld [vmem:[%s1062_s3 + $0x30] sm:$0xff]  }
   0x3   :  { %737 = vmatpush3.bf16.msra.mxu0 %v124_v2  ;;  %738 = vmatprep.mubr.msk.bf16.mxu0 %vm97_vm1, %v820_v1  ;;  %v828_v6 = vld [vmem:[%s1062_s3 + $0x38] sm:$0xff]   ;;  %v824_v8 = vld [vmem:[%s1061_s0 + $0x20] sm:$0xff]   ;;  %v830_v9 = vld [vmem:[%s1062_s3 + $0x28] sm:$0xff]  }
   0x4   :  { %754 = vmatprep.subr.bf16.mxu1 %v828_v6  ;;  %v831_v10 = vld [vmem:[%s1062_s3 + $0x20] sm:$0xff]   ;;  %v825_v11 = vld [vmem:[%s1061_s0 + $0x28] sm:$0xff]   ;;  %v826_v12 = vld [vmem:[%s1061_s0 + $0x30] sm:$0xff]  }
   0x5   :  { %755 = vmatpush3.bf16.msra.mxu1 %v828_v6  ;;  %v827_v13 = vld [vmem:[%s1061_s0 + $0x38] sm:$0xff]   ;;  %v833_v15 = vld [vmem:[%s1062_s3 + $0x10] sm:$0xff]   ;;  %v834_v16 = vld [vmem:[%s1062_s3 + $0x8] sm:$0xff]  }
   0x6   :  { %739 = vmatmul.mubr.msk.bf16.vlgmr.msra.gmra.mxu0 %vm97_vm1, %v821_v3  ;;  %756 = vmatprep.subr.bf16.mxu1 %v829_v7  ;;  %v832_v14 = vld [vmem:[%s1062_s3 + $0x18] sm:$0xff]   ;;  %v835_v17 = vld [vmem:[%s1062_s3] sm:$0xff]   ;;  %v837_v19 = vld [vmem:[%s1063_s5 + $0x30] sm:$0xff]  }
   0x7   :  { %742 = vmatprep.mubr.msk.bf16.mxu0 %vm97_vm1, %v822_v4  ;;  %v836_v18 = vld [vmem:[%s1063_s5 + $0x38] sm:$0xff]   ;;  %v838_v20 = vld [vmem:[%s1063_s5 + $0x28] sm:$0xff]   ;;  %v839_v21 = vld [vmem:[%s1063_s5 + $0x20] sm:$0xff]  }
   0x8   :  { %786 = vmatprep.subr.bf16.mxu0 %v836_v18  ;;  %v840_v22 = vld [vmem:[%s1063_s5 + $0x18] sm:$0xff]   ;;  %v961_v24 = vld [vmem:[%s1064_s2] ss:$0 sm:$0xff] }
   0x9   :  { %757 = vmatpush3.bf16.msra.mxu1 %v829_v7  ;;  %787 = vmatpush3.bf16.msra.mxu0 %v836_v18 }
   0xa   :  { %758 = vmatprep.subr.bf16.mxu1 %v830_v9  ;;  %788 = vmatprep.subr.bf16.mxu0 %v837_v19 }
   0xd   :  { %759 = vmatpush3.bf16.msra.mxu1 %v830_v9  ;;  %789 = vmatpush3.bf16.msra.mxu0 %v837_v19 }
   0xe   :  { %743 = vmatmul.mubr.msk.bf16.gmra.mxu0 %vm97_vm1, %v823_v5  ;;  %760 = vmatprep.subr.bf16.mxu1 %v831_v10 }
   0xf   :  { %746 = vmatprep.mubr.msk.bf16.mxu0 %vm97_vm1, %v824_v8  ;;  %790 = vmatprep.subr.bf16.mxu0 %v838_v20 }
  0x11   :  { %761 = vmatpush3.bf16.msra.mxu1 %v831_v10  ;;  %791 = vmatpush3.bf16.msra.mxu0 %v838_v20 }
  0x12   :  { %762 = vmatprep.subr.bf16.mxu1 %v832_v14  ;;  %792 = vmatprep.subr.bf16.mxu0 %v839_v21 }
  0x15   :  { %763 = vmatpush3.bf16.msra.mxu1 %v832_v14  ;;  %793 = vmatpush3.bf16.msra.mxu0 %v839_v21 }
  0x16   :  { %747 = vmatmul.mubr.msk.bf16.gmra.mxu0 %vm97_vm1, %v825_v11  ;;  %764 = vmatprep.subr.bf16.mxu1 %v833_v15 }
  0x17   :  { %750 = vmatprep.mubr.msk.bf16.mxu0 %vm97_vm1, %v826_v12  ;;  %794 = vmatprep.subr.bf16.mxu0 %v840_v22 }
  0x19   :  { %765 = vmatpush3.bf16.msra.mxu1 %v833_v15  ;;  %795 = vmatpush3.bf16.msra.mxu0 %v840_v22 }
  0x1a   :  { %766 = vmatprep.subr.bf16.mxu1 %v834_v16 }
  0x1d   :  { %767 = vmatpush3.bf16.msra.mxu1 %v834_v16 }
  0x1e   :  { %751 = vmatmul.mubr.msk.bf16.gmra.mxu0 %vm97_vm1, %v827_v13  ;;  %768 = vmatprep.subr.bf16.mxu1 %v835_v17 }
  0x21   :  { %769 = vmatpush3.bf16.msra.mxu1 %v835_v17 }
  0xc6   :  { %v740_v23 = vpop.f32.mrf.mxu0 }
  0xc7   :  { %v169_v27 = vadd.f32 %v740_v23, %v961_v24 }
  0xc8   :  { %v160_v25 = vpop.f32.mrf.mxu0 }
  0xc9   :  { %v161_v26 = vadd.f32 %v961_v24, %v160_v25  ;;  %v225_v34 = vmul.f32 0.01, %v169_v27 }
  0xca   :  { %v741_v28 = vpop.f32.mrf.mxu0 }
  0xcb   :  { %v172_v29 = vadd.f32 %v741_v28, %v961_v24  ;;  %v223_v31 = vmul.f32 0.01, %v161_v26  ;;  %v241_v42 = vmax.f32 %v169_v27, %v225_v34  ;;  %v843_v34 = vld [vmem:[%s1063_s5] sm:$0xff]  }
  0xcc   :  { %v163_v30 = vpop.f32.mrf.mxu0 }
  0xcd   :  { %v226_v32 = vmul.f32 0.01, %v172_v29  ;;  %v164_v33 = vadd.f32 %v961_v24, %v163_v30  ;;  %v239_v40 = vmax.f32 %v161_v26, %v223_v31 }
  0xce   :  { %v744_v35 = vpop.f32.mrf.mxu0 }
  0xcf   :  { %v224_v36 = vmul.f32 0.01, %v164_v33  ;;  %v242_v37 = vmax.f32 %v172_v29, %v226_v32  ;;  %v185_v43 = vadd.f32 %v744_v35, %v961_v24 }
  0xd0   :  { %v176_v38 = vpop.f32.mrf.mxu0 }
  0xd1   :  { %v177_v39 = vadd.f32 %v961_v24, %v176_v38  ;;  %v240_v41 = vmax.f32 %v164_v33, %v224_v36  ;;  %v256_v48 = vpack.c.bf16 %v242_v37, %v241_v42  ;;  %v229_v52 = vmul.f32 0.01, %v185_v43  ;;  %v841_v33 = vld [vmem:[%s1063_s5 + $0x10] sm:$0xff]   ;;  %v991_v36 = vld [vmem:[%s1065_s4] ss:$0 sm:$0xff] }
  0xd2   :  { %v745_v44 = vpop.f32.mrf.mxu0  ;;  %796 = vmatprep.subr.bf16.mxu0 %v841_v33 }
  0xd3   :  { %v188_v45 = vadd.f32 %v745_v44, %v961_v24  ;;  %v255_v46 = vpack.c.bf16 %v240_v41, %v239_v40  ;;  %v227_v49 = vmul.f32 0.01, %v177_v39  ;;  %v245_v60 = vmax.f32 %v185_v43, %v229_v52  ;;  %797 = vmatpush3.bf16.msra.mxu0 %v841_v33 }
  0xd4   :  { %v179_v47 = vpop.f32.mrf.mxu0 }
  0xd5   :  { %v230_v50 = vmul.f32 0.01, %v188_v45  ;;  %v180_v51 = vadd.f32 %v961_v24, %v179_v47  ;;  %770 = vmatprep.mubr.bf16.mxu1 %v255_v46  ;;  %v243_v57 = vmax.f32 %v177_v39, %v227_v49 }
  0xd6   :  { %v748_v53 = vpop.f32.mrf.mxu0  ;;  %771 = vmatmul.mubr.bf16.vlgmr.msra.gmra.mxu1 %v256_v48 }
  0xd7   :  { %v228_v54 = vmul.f32 0.01, %v180_v51  ;;  %v246_v55 = vmax.f32 %v188_v45, %v230_v50  ;;  %v201_v61 = vadd.f32 %v748_v53, %v961_v24 }
  0xd8   :  { %v192_v56 = vpop.f32.mrf.mxu0 }
  0xd9   :  { %v244_v58 = vmax.f32 %v180_v51, %v228_v54  ;;  %v193_v59 = vadd.f32 %v961_v24, %v192_v56  ;;  %v258_v2 = vpack.c.bf16 %v246_v55, %v245_v60  ;;  %v233_v6 = vmul.f32 0.01, %v201_v61 }
  0xda   :  { %v749_v62 = vpop.f32.mrf.mxu0 }
  0xdb   :  { %v204_v63 = vadd.f32 %v749_v62, %v961_v24  ;;  %v257_v0 = vpack.c.bf16 %v244_v58, %v243_v57  ;;  %v231_v3 = vmul.f32 0.01, %v193_v59  ;;  %v249_v14 = vmax.f32 %v201_v61, %v233_v6 }
  0xdc   :  { %v195_v1 = vpop.f32.mrf.mxu0 }
  0xdd   :  { %v234_v4 = vmul.f32 0.01, %v204_v63  ;;  %v196_v5 = vadd.f32 %v961_v24, %v195_v1  ;;  %774 = vmatprep.mubr.bf16.mxu1 %v257_v0  ;;  %v247_v11 = vmax.f32 %v193_v59, %v231_v3 }
  0xde   :  { %v752_v7 = vpop.f32.mrf.mxu0  ;;  %775 = vmatmul.mubr.bf16.gmra.mxu1 %v258_v2 }
  0xdf   :  { %v232_v8 = vmul.f32 0.01, %v196_v5  ;;  %v250_v9 = vmax.f32 %v204_v63, %v234_v4  ;;  %v217_v15 = vadd.f32 %v752_v7, %v961_v24 }
  0xe0   :  { %v208_v10 = vpop.f32.mrf.mxu0 }
  0xe1   :  { %v248_v12 = vmax.f32 %v196_v5, %v232_v8  ;;  %v209_v13 = vadd.f32 %v961_v24, %v208_v10  ;;  %v260_v20 = vpack.c.bf16 %v250_v9, %v249_v14  ;;  %v237_v25 = vmul.f32 0.01, %v217_v15 }
  0xe2   :  { %v753_v16 = vpop.f32.mrf.mxu0 }
  0xe3   :  { %v220_v17 = vadd.f32 %v753_v16, %v961_v24  ;;  %v259_v18 = vpack.c.bf16 %v248_v12, %v247_v11  ;;  %v235_v21 = vmul.f32 0.01, %v209_v13  ;;  %v253_v30 = vmax.f32 %v217_v15, %v237_v25 }
  0xe4   :  { %v211_v19 = vpop.f32.mrf.mxu0 }
  0xe5   :  { %v238_v22 = vmul.f32 0.01, %v220_v17  ;;  %v212_v23 = vadd.f32 %v961_v24, %v211_v19  ;;  %778 = vmatprep.mubr.bf16.mxu1 %v259_v18  ;;  %v251_v28 = vmax.f32 %v209_v13, %v235_v21  ;;  %v842_v24 = vld [vmem:[%s1063_s5 + $0x8] sm:$0xff]  }
  0xe6   :  { %779 = vmatmul.mubr.bf16.gmra.mxu1 %v260_v20  ;;  %798 = vmatprep.subr.bf16.mxu0 %v842_v24 }
  0xe7   :  { %v236_v26 = vmul.f32 0.01, %v212_v23  ;;  %v254_v27 = vmax.f32 %v220_v17, %v238_v22  ;;  %799 = vmatpush3.bf16.msra.mxu0 %v842_v24 }
  0xe8   :  { %800 = vmatprep.subr.bf16.mxu0 %v843_v34 }
  0xe9   :  { %v252_v29 = vmax.f32 %v212_v23, %v236_v26  ;;  %v262_v32 = vpack.c.bf16 %v254_v27, %v253_v30 }
  0xeb   :  { %v261_v31 = vpack.c.bf16 %v252_v29, %v251_v28  ;;  %801 = vmatpush3.bf16.msra.mxu0 %v843_v34 }
  0xed   :  { %782 = vmatprep.mubr.bf16.mxu1 %v261_v31 }
  0xee   :  { %783 = vmatmul.mubr.bf16.gmra.mxu1 %v262_v32 }
 0x196   :  { %v772_v35 = vpop.f32.mrf.mxu1 }
 0x197   :  { %v377_v39 = vadd.f32 %v772_v35, %v991_v36 }
 0x198   :  { %v368_v37 = vpop.f32.mrf.mxu1 }
 0x199   :  { %v369_v38 = vadd.f32 %v991_v36, %v368_v37  ;;  %v433_v46 = vmul.f32 0.01, %v377_v39 }
 0x19a   :  { %v773_v40 = vpop.f32.mrf.mxu1 }
 0x19b   :  { %v380_v41 = vadd.f32 %v773_v40, %v991_v36  ;;  %v431_v43 = vmul.f32 0.01, %v369_v38  ;;  %v449_v54 = vmax.f32 %v377_v39, %v433_v46 }
 0x19c   :  { %v371_v42 = vpop.f32.mrf.mxu1 }
 0x19d   :  { %v434_v44 = vmul.f32 0.01, %v380_v41  ;;  %v372_v45 = vadd.f32 %v991_v36, %v371_v42  ;;  %v447_v51 = vmax.f32 %v369_v38, %v431_v43 }
 0x19e   :  { %v776_v47 = vpop.f32.mrf.mxu1 }
 0x19f   :  { %v432_v48 = vmul.f32 0.01, %v372_v45  ;;  %v450_v49 = vmax.f32 %v380_v41, %v434_v44  ;;  %v393_v55 = vadd.f32 %v776_v47, %v991_v36 }
 0x1a0   :  { %v384_v50 = vpop.f32.mrf.mxu1 }
 0x1a1   :  { %v448_v52 = vmax.f32 %v372_v45, %v432_v48  ;;  %v385_v53 = vadd.f32 %v991_v36, %v384_v50  ;;  %v464_v59 = vpack.c.bf16 %v450_v49, %v449_v54  ;;  %v437_v0 = vmul.f32 0.01, %v393_v55  ;;  %v686_v45 = vld [vmem:[%s1066_s6] ss:$0 sm:$0xff] }
 0x1a2   :  { %v777_v56 = vpop.f32.mrf.mxu1 }
 0x1a3   :  { %v396_v57 = vadd.f32 %v777_v56, %v991_v36  ;;  %v463_v58 = vpack.c.bf16 %v448_v52, %v447_v51  ;;  %v435_v61 = vmul.f32 0.01, %v385_v53  ;;  %v453_v8 = vmax.f32 %v393_v55, %v437_v0 }
 0x1a4   :  { %v387_v60 = vpop.f32.mrf.mxu1 }
 0x1a5   :  { %v438_v62 = vmul.f32 0.01, %v396_v57  ;;  %v388_v63 = vadd.f32 %v991_v36, %v387_v60  ;;  %802 = vmatprep.mubr.bf16.mxu0 %v463_v58  ;;  %v451_v5 = vmax.f32 %v385_v53, %v435_v61 }
 0x1a6   :  { %v780_v1 = vpop.f32.mrf.mxu1  ;;  %803 = vmatmul.mubr.bf16.vlgmr.msra.gmra.mxu0 %v464_v59 }
 0x1a7   :  { %v436_v2 = vmul.f32 0.01, %v388_v63  ;;  %v454_v3 = vmax.f32 %v396_v57, %v438_v62  ;;  %v409_v9 = vadd.f32 %v780_v1, %v991_v36 }
 0x1a8   :  { %v400_v4 = vpop.f32.mrf.mxu1 }
 0x1a9   :  { %v452_v6 = vmax.f32 %v388_v63, %v436_v2  ;;  %v401_v7 = vadd.f32 %v991_v36, %v400_v4  ;;  %v466_v14 = vpack.c.bf16 %v454_v3, %v453_v8  ;;  %v441_v18 = vmul.f32 0.01, %v409_v9 }
 0x1aa   :  { %v781_v10 = vpop.f32.mrf.mxu1 }
 0x1ab   :  { %v412_v11 = vadd.f32 %v781_v10, %v991_v36  ;;  %v465_v12 = vpack.c.bf16 %v452_v6, %v451_v5  ;;  %v439_v15 = vmul.f32 0.01, %v401_v7  ;;  %v457_v27 = vmax.f32 %v409_v9, %v441_v18 }
 0x1ac   :  { %v403_v13 = vpop.f32.mrf.mxu1 }
 0x1ad   :  { %v442_v16 = vmul.f32 0.01, %v412_v11  ;;  %v404_v17 = vadd.f32 %v991_v36, %v403_v13  ;;  %806 = vmatprep.mubr.bf16.mxu0 %v465_v12  ;;  %v455_v23 = vmax.f32 %v401_v7, %v439_v15 }
 0x1ae   :  { %v784_v19 = vpop.f32.mrf.mxu1  ;;  %807 = vmatmul.mubr.bf16.gmra.mxu0 %v466_v14 }
 0x1af   :  { %v440_v20 = vmul.f32 0.01, %v404_v17  ;;  %v458_v21 = vmax.f32 %v412_v11, %v442_v16  ;;  %v425_v28 = vadd.f32 %v784_v19, %v991_v36 }
 0x1b0   :  { %v416_v22 = vpop.f32.mrf.mxu1 }
 0x1b1   :  { %v456_v25 = vmax.f32 %v404_v17, %v440_v20  ;;  %v417_v26 = vadd.f32 %v991_v36, %v416_v22  ;;  %v468_v33 = vpack.c.bf16 %v458_v21, %v457_v27  ;;  %v445_v37 = vmul.f32 0.01, %v425_v28 }
 0x1b2   :  { %v785_v29 = vpop.f32.mrf.mxu1 }
 0x1b3   :  { %v428_v30 = vadd.f32 %v785_v29, %v991_v36  ;;  %v467_v31 = vpack.c.bf16 %v456_v25, %v455_v23  ;;  %v443_v24 = vmul.f32 0.01, %v417_v26  ;;  %v461_v42 = vmax.f32 %v425_v28, %v445_v37 }
 0x1b4   :  { %v419_v32 = vpop.f32.mrf.mxu1 }
 0x1b5   :  { %v446_v34 = vmul.f32 0.01, %v428_v30  ;;  %v420_v35 = vadd.f32 %v991_v36, %v419_v32  ;;  %810 = vmatprep.mubr.bf16.mxu0 %v467_v31  ;;  %v459_v40 = vmax.f32 %v417_v26, %v443_v24 }
 0x1b6   :  { %811 = vmatmul.mubr.bf16.gmra.mxu0 %v468_v33 }
 0x1b7   :  { %v444_v38 = vmul.f32 0.01, %v420_v35  ;;  %v462_v39 = vmax.f32 %v428_v30, %v446_v34 }
 0x1b9   :  { %v460_v41 = vmax.f32 %v420_v35, %v444_v38  ;;  %v470_v44 = vpack.c.bf16 %v462_v39, %v461_v42 }
 0x1bb   :  { %v469_v43 = vpack.c.bf16 %v460_v41, %v459_v40 }
 0x1bd   :  { %814 = vmatprep.mubr.bf16.mxu0 %v469_v43 }
 0x1be   :  { %815 = vmatmul.mubr.bf16.gmra.mxu0 %v470_v44 }
 0x266   :  { %v804_v46 = vpop.f32.mrf.mxu0 }
 0x267   :  { %v585_v47 = vadd.f32 %v804_v46, %v686_v45 }
 0x268   :  { %v576_v48 = vpop.f32.mrf.mxu0 }
 0x269   :  { %641 = vst [vmem:[%s1067_s7 + $0x10] sm:$0xff] %v585_v47  ;;  %v577_v36 = vadd.f32 %v686_v45, %v576_v48 }
 0x26a   :  { %v805_v49 = vpop.f32.mrf.mxu0 }
 0x26b   :  { %639 = vst [vmem:[%s1067_s7] sm:$0xff] %v577_v36  ;;  %v588_v50 = vadd.f32 %v805_v49, %v686_v45 }
 0x26c   :  { %v579_v51 = vpop.f32.mrf.mxu0 }
 0x26d   :  { %642 = vst [vmem:[%s1067_s7 + $0x18] sm:$0xff] %v588_v50  ;;  %v580_v52 = vadd.f32 %v686_v45, %v579_v51 }
 0x26e   :  { %v808_v53 = vpop.f32.mrf.mxu0 }
 0x26f   :  { %640 = vst [vmem:[%s1067_s7 + $0x8] sm:$0xff] %v580_v52  ;;  %v601_v54 = vadd.f32 %v808_v53, %v686_v45 }
 0x270   :  { %v592_v55 = vpop.f32.mrf.mxu0 }
 0x271   :  { %645 = vst [vmem:[%s1067_s7 + $0x30] sm:$0xff] %v601_v54  ;;  %v593_v56 = vadd.f32 %v686_v45, %v592_v55 }
 0x272   :  { %v809_v57 = vpop.f32.mrf.mxu0 }
 0x273   :  { %643 = vst [vmem:[%s1067_s7 + $0x20] sm:$0xff] %v593_v56  ;;  %v604_v58 = vadd.f32 %v809_v57, %v686_v45 }
 0x274   :  { %v595_v59 = vpop.f32.mrf.mxu0 }
 0x275   :  { %646 = vst [vmem:[%s1067_s7 + $0x38] sm:$0xff] %v604_v58  ;;  %v596_v60 = vadd.f32 %v686_v45, %v595_v59 }
 0x276   :  { %v812_v61 = vpop.f32.mrf.mxu0 }
 0x277   :  { %644 = vst [vmem:[%s1067_s7 + $0x28] sm:$0xff] %v596_v60  ;;  %v617_v62 = vadd.f32 %v812_v61, %v686_v45 }
 0x278   :  { %v608_v63 = vpop.f32.mrf.mxu0 }
 0x279   :  { %649 = vst [vmem:[%s1067_s7 + $0x50] sm:$0xff] %v617_v62  ;;  %v609_v0 = vadd.f32 %v686_v45, %v608_v63 }
 0x27a   :  { %v813_v1 = vpop.f32.mrf.mxu0 }
 0x27b   :  { %647 = vst [vmem:[%s1067_s7 + $0x40] sm:$0xff] %v609_v0  ;;  %v620_v2 = vadd.f32 %v813_v1, %v686_v45 }
 0x27c   :  { %v611_v3 = vpop.f32.mrf.mxu0 }
 0x27d   :  { %650 = vst [vmem:[%s1067_s7 + $0x58] sm:$0xff] %v620_v2  ;;  %v612_v4 = vadd.f32 %v686_v45, %v611_v3 }
 0x27e   :  { %v816_v5 = vpop.f32.mrf.mxu0 }
 0x27f   :  { %648 = vst [vmem:[%s1067_s7 + $0x48] sm:$0xff] %v612_v4  ;;  %v633_v6 = vadd.f32 %v816_v5, %v686_v45 }
 0x280   :  { %v624_v7 = vpop.f32.mrf.mxu0 }
 0x281   :  { %653 = vst [vmem:[%s1067_s7 + $0x70] sm:$0xff] %v633_v6  ;;  %v625_v8 = vadd.f32 %v686_v45, %v624_v7 }
 0x282   :  { %v817_v9 = vpop.f32.mrf.mxu0 }
 0x283   :  { %651 = vst [vmem:[%s1067_s7 + $0x60] sm:$0xff] %v625_v8  ;;  %v636_v10 = vadd.f32 %v817_v9, %v686_v45 }
 0x284   :  { %v627_v11 = vpop.f32.mrf.mxu0 }
 0x285   :  { %654 = vst [vmem:[%s1067_s7 + $0x78] sm:$0xff] %v636_v10  ;;  %v628_v12 = vadd.f32 %v686_v45, %v627_v11 }
 0x287   :  { %652 = vst [vmem:[%s1067_s7 + $0x68] sm:$0xff] %v628_v12 }

</bundles_post_ra>
